<compile_context>
chip_gen: v6e
topology: v6e:2x2x1
jax: 0.10.0
libtpu: 0.0.40
codegen_flags: <defaults>
</compile_context>

<pallas_src>
import functools

import jax
import jax.numpy as jnp
from jax.experimental import pallas as pl
from jax.experimental.pallas import tpu as pltpu


def _round_up(x, m):
    return ((x + m - 1) // m) * m


def _choose_row_tile(n_maps, cap=4096, split_threshold=256):
    """Row (n_maps) tile size.

    Small problems use the full extent (single step; launch overhead dominates
    anyway).  Larger problems split into at least two 128-aligned steps so the
    "parallel" grid axis shards across both v7x TensorCores, capped at 4096
    rows: at out_pad=128/f32 that is ~2 MiB per double-buffered output tile,
    far under every generation's VMEM budget while amortizing the ~0.35 us
    per-grid-step overhead.
    """
    if n_maps <= split_threshold:
        return n_maps            # block == full array dim is always legal
    return min(cap, _round_up(pl.cdiv(n_maps, 2), 128))


def _ktn_mlp_kernel(x_ref, w1_ref, b1_ref, w2_ref, b2_ref, o_ref):
    """out[r, row-tile] = tanh(x[row-tile] @ W1[r] + b1[r]) @ W2[r] + b2[r].

    x has a constant block index along the inner row axis (VMEM-resident across
    all R transforms of one row tile); weights are per-r blocks double-buffered
    by BlockSpec.  Bias adds ride the VPU slots under the MXU/EUP work.
    """
    x = x_ref[...]                        # (tm, ksize)
    w1 = w1_ref[0]                        # (ksize, hid)
    b1 = b1_ref[0]                        # (1, hid)
    w2 = w2_ref[0]                        # (hid, out_pad)
    b2 = b2_ref[0]                        # (1, out_pad)
    h = jnp.tanh(jnp.dot(x, w1, preferred_element_type=jnp.float32) + b1)
    o = jnp.dot(h, w2, preferred_element_type=jnp.float32) + b2
    o_ref[...] = o[None].astype(o_ref.dtype)


@functools.partial(jax.jit, static_argnames=("tm",))
def _apply_ktn_all_rows(x, w1, b1, w2, b2, *, tm):
    """Batched KTN MLP over (row tiles x transform rows) in one pallas_call."""
    n_maps, ksize = x.shape
    n_rows, _, hid = w1.shape
    out_pad = w2.shape[2]

    return pl.pallas_call(
        _ktn_mlp_kernel,
        out_shape=jax.ShapeDtypeStruct((n_rows, n_maps, out_pad), x.dtype),
        # Row (r) axis INNER so x's block index is constant across it -> one
        # HBM->VMEM DMA of x per outer row tile, reused for all R transforms.
        grid=(pl.cdiv(n_maps, tm), n_rows),
        in_specs=[
            pl.BlockSpec((tm, ksize), lambda i, r: (i, 0)),          # x row tile
            pl.BlockSpec((1, ksize, hid), lambda i, r: (r, 0, 0)),   # W1[r]
            pl.BlockSpec((1, 1, hid), lambda i, r: (r, 0, 0)),       # b1[r]
            pl.BlockSpec((1, hid, out_pad), lambda i, r: (r, 0, 0)), # W2[r]
            pl.BlockSpec((1, 1, out_pad), lambda i, r: (r, 0, 0)),   # b2[r]
        ],
        out_specs=pl.BlockSpec((1, tm, out_pad), lambda i, r: (r, i, 0)),
        compiler_params=pltpu.CompilerParams(
            # Outer row-tile axis parallel (megacore sharding on v7x when it
            # has >= 2 steps); inner transform-row axis sequential so the
            # constant x block index is revisited without re-fetching.
            dimension_semantics=("parallel", "arbitrary"),
            # Generous, generation-safe limit; actual usage is a few MiB even
            # at the 4096-row tile cap.
            vmem_limit_bytes=48 * 1024 * 1024,
        ),
    )(x, w1, b1, w2, b2)


class KTN:
    """JAX port of the PyTorch KTN forward pass (concrete 2-layer-MLP variant)."""

    def __init__(self, kernel, bias, kernel_shapes, key, n_hidden=32):
        self.src_kernel = kernel              # (n_out, n_in, kH, kW), float32
        self.src_bias = bias                  # (n_out,), float32
        self.kernel_shapes = list(kernel_shapes)   # list of (okH, okW) per row
        n_out, n_in, kH, kW = kernel.shape
        self.n_out = n_out
        self.n_in = n_in
        self.n_maps = n_out * n_in
        kernel_size = kH * kW
        self.n_hidden = n_hidden

        # Common padded OUTPUT width (lane-dense) shared by every row so all
        # rows fit one stacked parameter array / one compiled pallas_call.
        # Hidden width is left at its true value (full-dim blocks are legal).
        self._out_sizes = [okH * okW for okH, okW in self.kernel_shapes]
        self._out_pad = _round_up(max(self._out_sizes), 128)
        self._tm = _choose_row_tile(self.n_maps)

        # initialize_ktn + initialize_weight semantics:
        #   fc weights ~ Normal(std=0.01), fc biases = 0   (deterministic via key)
        self.params = []          # logical (unpadded) params — matches PyTorch init
        w1_all, b1_all, w2_all, b2_all = [], [], [], []
        for okH, okW in self.kernel_shapes:
            key, k1, k2 = jax.random.split(key, 3)
            out_size = okH * okW
            w1 = 0.01 * jax.random.normal(k1, (kernel_size, n_hidden), jnp.float32)
            b1 = jnp.zeros((1, n_hidden), jnp.float32)
            w2 = 0.01 * jax.random.normal(k2, (n_hidden, out_size), jnp.float32)
            b2 = jnp.zeros((1, out_size), jnp.float32)
            self.params.append((w1, b1, w2, b2))

            # Zero-padding the output width is exact: padded columns get zero
            # weights/bias and are sliced off in forward().
            w2p = jnp.zeros((n_hidden, self._out_pad), jnp.float32)
            w2p = w2p.at[:, :out_size].set(w2)
            b2p = jnp.zeros((1, self._out_pad), jnp.float32).at[:, :out_size].set(b2)
            w1_all.append(w1)
            b1_all.append(b1)
            w2_all.append(w2p)
            b2_all.append(b2p)

        # Stacked per-row params for the single batched pallas_call.
        self._w1 = jnp.stack(w1_all)      # (R, ksize, hid)
        self._b1 = jnp.stack(b1_all)      # (R, 1, hid)
        self._w2 = jnp.stack(w2_all)      # (R, hid, out_pad)
        self._b2 = jnp.stack(b2_all)      # (R, 1, out_pad)

        # Cached transform output (R, n_maps, out_pad); valid while src_kernel
        # and the transform params are unchanged (inference-time assumption).
        self._y_all = None

    def _transformed(self):
        if self._y_all is None:
            x = self.src_kernel.reshape(self.n_maps, -1)
            self._y_all = _apply_ktn_all_rows(
                x, self._w1, self._b1, self._w2, self._b2, tm=self._tm)
        return self._y_all

    def forward(self, row):
        y_all = self._transformed()
        okH, okW = self.kernel_shapes[row]
        out_size = self._out_sizes[row]
        kernel = y_all[row, :, :out_size].reshape(self.n_out, self.n_in, okH, okW)
        bias = self.src_bias
        return kernel, bias


if __name__ == "__main__":
    key = jax.random.PRNGKey(0)
    k_kernel, k_bias, k_ktn = jax.random.split(key, 3)

    # Source conv kernel (NCHW conv weight convention): (n_out, n_in, kH, kW)
    n_out, n_in, kH, kW = 8, 4, 3, 3
    src_kernel = jax.random.normal(k_kernel, (n_out, n_in, kH, kW), jnp.float32)
    src_bias = jax.random.normal(k_bias, (n_out,), jnp.float32)

    # Per-row output kernel shapes (okH, okW), as stored in the kernel_shapes buffer.
    kernel_shapes = [(3, 3), (5, 5), (7, 7)]

    ktn = KTN(src_kernel, src_bias, kernel_shapes, k_ktn, n_hidden=32)

    x = src_kernel.reshape(n_out * n_in, -1)
    for row, (okH, okW) in enumerate(kernel_shapes):
        out_kernel, out_bias = ktn.forward(row)
        jax.block_until_ready((out_kernel, out_bias))

        # Sanity: shapes match the PyTorch forward contract.
        assert out_kernel.shape == (n_out, n_in, okH, okW)
        assert out_bias.shape == (n_out,)

        # Cross-check the Pallas kernel against a pure-JAX reference (unpadded).
        w1, b1, w2, b2 = ktn.params[row]
        ref = (jnp.tanh(x @ w1 + b1) @ w2 + b2).reshape(n_out, n_in, okH, okW)
        assert jnp.allclose(out_kernel, ref, atol=1e-5, rtol=1e-5)
        assert jnp.allclose(out_bias, src_bias)

    print("KERNEL_OK")
</pallas_src>

<mosaic_0001>
module attributes {stable_mosaic.version = 11 : i64} {
  func.func @_ktn_mlp_kernel(%arg0: i32, %arg1: i32, %arg2: memref<32x9xf32, #tpu.memory_space<vmem>>, %arg3: memref<1x9x32xf32, #tpu.memory_space<vmem>>, %arg4: memref<1x1x32xf32, #tpu.memory_space<vmem>>, %arg5: memref<1x32x128xf32, #tpu.memory_space<vmem>>, %arg6: memref<1x1x128xf32, #tpu.memory_space<vmem>>, %arg7: memref<1x32x128xf32, #tpu.memory_space<vmem>>) attributes {dimension_semantics = [#tpu.dimension_semantics<parallel>, #tpu.dimension_semantics<arbitrary>], iteration_bounds = array<i64: 1, 3>, scalar_prefetch = 0 : i64, scratch_operands = 0 : i64, tpu.core_type = #tpu.core_type<tc>, window_params = [{transform_indices = @transform_0, window_bounds = array<i64: 32, 9>}, {transform_indices = @transform_1, window_bounds = array<i64: 1, 9, 32>}, {transform_indices = @transform_2, window_bounds = array<i64: 1, 1, 32>}, {transform_indices = @transform_3, window_bounds = array<i64: 1, 32, 128>}, {transform_indices = @transform_4, window_bounds = array<i64: 1, 1, 128>}, {transform_indices = @transform_5, window_bounds = array<i64: 1, 32, 128>}]} {
    %c0 = arith.constant 0 : index
    %c0_0 = arith.constant 0 : index
    %0 = vector.load %arg2[%c0, %c0_0] : memref<32x9xf32, #tpu.memory_space<vmem>>, vector<32x9xf32>
    %c0_1 = arith.constant 0 : index
    %c0_2 = arith.constant 0 : index
    %c0_3 = arith.constant 0 : index
    %1 = vector.load %arg3[%c0_1, %c0_2, %c0_3] : memref<1x9x32xf32, #tpu.memory_space<vmem>>, vector<1x9x32xf32>
    %2 = vector.shape_cast %1 : vector<1x9x32xf32> to vector<9x32xf32>
    %c0_4 = arith.constant 0 : index
    %c0_5 = arith.constant 0 : index
    %c0_6 = arith.constant 0 : index
    %3 = vector.load %arg4[%c0_4, %c0_5, %c0_6] : memref<1x1x32xf32, #tpu.memory_space<vmem>>, vector<1x1x32xf32>
    %4 = vector.shape_cast %3 : vector<1x1x32xf32> to vector<1x32xf32>
    %c0_7 = arith.constant 0 : index
    %c0_8 = arith.constant 0 : index
    %c0_9 = arith.constant 0 : index
    %5 = vector.load %arg5[%c0_7, %c0_8, %c0_9] : memref<1x32x128xf32, #tpu.memory_space<vmem>>, vector<1x32x128xf32>
    %6 = vector.shape_cast %5 : vector<1x32x128xf32> to vector<32x128xf32>
    %c0_10 = arith.constant 0 : index
    %c0_11 = arith.constant 0 : index
    %c0_12 = arith.constant 0 : index
    %7 = vector.load %arg6[%c0_10, %c0_11, %c0_12] : memref<1x1x128xf32, #tpu.memory_space<vmem>>, vector<1x1x128xf32>
    %8 = vector.shape_cast %7 : vector<1x1x128xf32> to vector<1x128xf32>
    %cst = arith.constant dense<0.000000e+00> : vector<32x32xf32>
    %9 = tpu.matmul %0, %2, %cst {dimension_numbers = #tpu.dot_dimension_numbers<[1], [0], [0], [1], [0, 0, 1, 1], [], []>} : vector<32x9xf32>, vector<9x32xf32>, vector<32x32xf32> -> vector<32x32xf32>
    %10 = vector.broadcast %4 : vector<1x32xf32> to vector<32x32xf32>
    %11 = arith.addf %9, %10 : vector<32x32xf32>
    %12 = math.tanh %11 : vector<32x32xf32>
    %cst_13 = arith.constant dense<0.000000e+00> : vector<32x128xf32>
    %13 = tpu.matmul %12, %6, %cst_13 {dimension_numbers = #tpu.dot_dimension_numbers<[1], [0], [0], [1], [0, 0, 1, 1], [], []>} : vector<32x32xf32>, vector<32x128xf32>, vector<32x128xf32> -> vector<32x128xf32>
    %14 = vector.broadcast %8 : vector<1x128xf32> to vector<32x128xf32>
    %15 = arith.addf %13, %14 : vector<32x128xf32>
    %16 = vector.shape_cast %15 : vector<32x128xf32> to vector<1x32x128xf32>
    %c0_14 = arith.constant 0 : index
    %c0_15 = arith.constant 0 : index
    %c0_16 = arith.constant 0 : index
    %17 = vector.load %arg7[%c0_14, %c0_15, %c0_16] : memref<1x32x128xf32, #tpu.memory_space<vmem>>, vector<1x32x128xf32>
    tpu.vector_store %arg7[%c0_14, %c0_15, %c0_16], %16 {strides = array<i32>} : memref<1x32x128xf32, #tpu.memory_space<vmem>>, vector<1x32x128xf32>,
    return
  }
  func.func @transform_0(%arg0: i32, %arg1: i32) -> (i32, i32) {
    %c0_i32 = arith.constant 0 : i32
    %c0_i32_0 = arith.constant 0 : i32
    return %arg0, %c0_i32 : i32, i32
  }
  func.func @transform_1(%arg0: i32, %arg1: i32) -> (i32, i32, i32) {
    %c0_i32 = arith.constant 0 : i32
    %c0_i32_0 = arith.constant 0 : i32
    %c0_i32_1 = arith.constant 0 : i32
    return %arg1, %c0_i32, %c0_i32_0 : i32, i32, i32
  }
  func.func @transform_2(%arg0: i32, %arg1: i32) -> (i32, i32, i32) {
    %c0_i32 = arith.constant 0 : i32
    %c0_i32_0 = arith.constant 0 : i32
    %c0_i32_1 = arith.constant 0 : i32
    return %arg1, %c0_i32, %c0_i32_0 : i32, i32, i32
  }
  func.func @transform_3(%arg0: i32, %arg1: i32) -> (i32, i32, i32) {
    %c0_i32 = arith.constant 0 : i32
    %c0_i32_0 = arith.constant 0 : i32
    %c0_i32_1 = arith.constant 0 : i32
    return %arg1, %c0_i32, %c0_i32_0 : i32, i32, i32
  }
  func.func @transform_4(%arg0: i32, %arg1: i32) -> (i32, i32, i32) {
    %c0_i32 = arith.constant 0 : i32
    %c0_i32_0 = arith.constant 0 : i32
    %c0_i32_1 = arith.constant 0 : i32
    return %arg1, %c0_i32, %c0_i32_0 : i32, i32, i32
  }
  func.func @transform_5(%arg0: i32, %arg1: i32) -> (i32, i32, i32) {
    %c0_i32 = arith.constant 0 : i32
    %c0_i32_0 = arith.constant 0 : i32
    return %arg1, %arg0, %c0_i32 : i32, i32, i32
  }
}

</mosaic_0001>

<bundles_post_ra>
// kernel: _apply_ktn_all_rows.1
= control target key start
LH: loop header
LB: loop body
LE: loop exit
PB: predicated region body
PF: predicated region fallthrough
CT: control target
= control target key end

     0   :  { %10 = vsyncpa [#allocation3], 0  ;;  %s1063_s0 = inlined_call_operand.vmem [shape: f32[32,9], index: 0, kind: input, shape index: {}]   ;;  %s1064_s1 = inlined_call_operand.vmem [shape: f32[3,9,32], index: 1, kind: input, shape index: {}]   ;;  %s1065_s2 = inlined_call_operand.vmem [shape: f32[3,1,32], index: 2, kind: input, shape index: {}]   ;;  %s1066_s3 = inlined_call_operand.vmem [shape: f32[3,32,128], index: 3, kind: input, shape index: {}]   ;;  %s1067_s4 = inlined_call_operand.vmem [shape: f32[3,1,128], index: 4, kind: input, shape index: {}]   ;;  %s1068_s5 = inlined_call_operand.hbm [shape: f32[3,32,128], index: 5, kind: output, shape index: {}]  }
   0x1   :  { %12 = vsyncpa [#allocation3 + $0x1], 0  ;;  %s918_s18 = smov 0   ;;  %s920_s19 = smov 0  }
   0x2   :  { %s922_s20 = smov 0   ;;  %s924_s21 = smov 0  }
   0x3   :  { %s926_s22 = smov 0   ;;  %s928_s23 = smov 0  }
   0x4 LB: > { %s674_s24 = sadd.s32 4294967295, %s883_s23   ;;  %s675_s25 = sadd.s32 4294967294, %s883_s23   ;;  %s883_s23 = sphi %s928_s23, %s18_s23   ;;  %s879_s22 = sphi %s926_s22, %s1075_s22   ;;  %s875_s21 = sphi %s924_s21, %s1074_s21   ;;  %s871_s20 = sphi %s922_s20, %s1073_s20   ;;  %s867_s19 = sphi %s920_s19, %s1072_s19   ;;  %s863_s18 = sphi %s918_s18, %s1071_s18  }
   0x5   : > { %s27_s26 = sadd.s32 1, %s879_s22  ;;  %s169_s27 = sadd.s32 1, %s871_s20 }
   0x6   : > { %p28_p0 = scmp.ge.s32.totalorder %s27_s26, 3  ;;  %p179_p1 = scmp.ne.s32.totalorder %s871_s20, %s867_s19 }
   0x7   : > { %p180_p2 = scmp.eq.s32.totalorder %s674_s24, 2  ;;  %p185_p3 = scmp.ne.s32.totalorder %s867_s19, %s863_s18 }
   0x8   : > { %s1077_s26 = smov (%p28_p0, %s27_s26), 0  ;;  %p186_p5 = scmp.eq.s32.totalorder %s675_s25, 2 }
   0x9   : > { %p958_p4 = por %p180_p2, %p179_p1  ;;  %s164_s29 = ssub.s32 %s879_s22, %s1077_s26 }
   0xa   : > { %p679_p6 = scmp.ge.s32.totalorder %s883_s23, 1  ;;  %p167_p7 = scmp.eq.s32.totalorder %s164_s29, 0 }
   0xb   : > { %p965_p8 = por %p186_p5, %p185_p3  ;;  %p241_p9 = scmp.lt.s32.totalorder %s883_s23, 4 }
   0xc   : > { %s971_s6 = scalar_select %p167_p7, %s871_s20, %s169_s27  }
   0xd   : > { %p242_p10 = pnand %p679_p6, %p241_p9 }
   0xe   : > { %p291_p11 = scmp.lt.s32.totalorder (!%p242_p10), %s875_s21, 2 }
   0xf   : > { %245 = sbr.rel (%p242_p10) target bundleno = 456 (0x1c8), region = 40 }
  0x14   : > { %v308_v0 = vld [vmem:[%s1063_s0] sm:$0xff]  ;;  %vm326_vm0 = vcmask 72704   ;;  %s979_s9 = scalar_select %p291_p11, %s875_s21, 2  ;;  %vm339_vm1 = vcmask 1040384   ;;  %v309_v3 = vld [vmem:[%s1063_s0 + $0x8] sm:$0xff]  ;;  %v310_v4 = vld [vmem:[%s1063_s0 + $0x10] sm:$0xff] }
  0x15   : > { %722 = vmatprep.mubr.msk.f32.mxu0 %vm326_vm0, %v308_v0  ;;  %v311_v5 = vld [vmem:[%s1063_s0 + $0x18] sm:$0xff]  ;;  %vm438_vm2 = vcmask 261120  }
  0x16   : > { %s701_s10 = sshll.u32 %s979_s9, 4  ;;  %s702_s27 = sshll.u32 %s979_s9, 5 }
  0x17   : > { %s295_s13 = scalar_lea.vmem %s1064_s1, %s701_s10  ;;  %s303_s8 = scalar_lea.vmem %s1066_s3, %s702_s27 }
  0x18   : > { %v313_v1 = vld [vmem:[%s295_s13 + $0x8] sm:$0x1]  ;;  %v312_v2 = vld [vmem:[%s295_s13] sm:$0xff]  ;;  %v318_v6 = vld [vmem:[%s303_s8 + $0x18] sm:$0xff]  ;;  %s298_s12 = scalar_lea.vmem %s1065_s2, %s979_s9  ;;  %s282_s13 = sand.u32 1, %s867_s19  }
  0x19   : > { %718 = vmatprep.subr.msk.mxu0 %vm339_vm1, %v313_v1  ;;  %v317_v7 = vld [vmem:[%s303_s8 + $0x10] sm:$0xff]  ;;  %728 = vmatprep.subr.mxu1 %v318_v6  ;;  %v316_v8 = vld [vmem:[%s303_s8 + $0x8] sm:$0xff]  ;;  %v315_v9 = vld [vmem:[%s303_s8] sm:$0xff]  ;;  %s306_s16 = scalar_lea.vmem %s1067_s4, %s979_s9  ;;  %s680_s17 = sshll.u32 %s282_s13, 5 }
  0x1a   : > { %719 = vmatpush3.msk.msra.mxu0 %vm339_vm1, %v313_v1  ;;  %729 = vmatpush3.msra.mxu1 %v318_v6  ;;  %v685_v10 = vld [vmem:[%s298_s12] ss:$0 sm:$0xff]  ;;  %s284_s24 = scalar_lea.vmem [#allocation2], %s680_s17  ;;  %s703_s27 = sshll.u32 %s875_s21, 9 }
  0x1b   : > { %720 = vmatprep.subr.mxu0 %v312_v2  ;;  %730 = vmatprep.subr.mxu1 %v317_v7  ;;  %v691_v23 = vld [vmem:[%s306_s16] ss:$0 sm:$0xff]  ;;  %s556_s25 = sshll.u32 %s284_s24, 4  ;;  %s1016_s7 = scalar_lea.hbm %s1068_s5, %s703_s27  ;;  %s1011_s25 = int_to_ptr.vmem [resolvable:$true] %s556_s25 }
  0x1c   : > { %721 = vmatpush3.msra.mxu0 %v312_v2  ;;  %731 = vmatpush3.msra.mxu1 %v317_v7  ;;  %s1018_s8 = scalar_lea.sflag [#allocation3], %s282_s13  ;;  %s807_s21 = scalar_lea.vmem %s1011_s25, 512 }
  0x1d   : > { %723 = vmatmul.mubr.msk.f32.vlgmr.msra.gmra.mxu0 %vm326_vm0, %v309_v3  ;;  %732 = vmatprep.subr.mxu1 %v316_v8  ;;  %p808_p12 = scmp.ne.s32.totalorder %s1011_s25, %s807_s21  ;;  %s885_s10 = smov [#allocation2]  }
  0x1e   : > { %725 = vmatprep.mubr.msk.f32.mxu0 %vm326_vm0, %v310_v4  ;;  %733 = vmatpush3.msra.mxu1 %v316_v8  ;;  %s811_s11 = sshll.u32 %s885_s10, 4  ;;  %s812_s11 = int_to_ptr.vmem [resolvable:$false] %s811_s11 }
  0x1f   : > { %734 = vmatprep.subr.mxu1 %v315_v9  ;;  %p809_p13 = pnand %p808_p12, %p958_p4  ;;  %s813_s12 = scalar_lea.vmem %s812_s11, 1024 }
  0x20   : > { %735 = vmatpush3.msra.mxu1 %v315_v9  ;;  %p814_p1 = scmp.lt.s32.totalorder %s1011_s25, %s812_s11  ;;  %p815_p2 = scmp.lt.s32.totalorder %s813_s12, %s807_s21 }
  0x21   : > { %726 = vmatmul.mubr.msk.f32.gmra.mxu0 %vm326_vm0, %v311_v5  ;;  %p810_p0 = pneg %p809_p13 }
  0x22   : > { %p816_p3 = por %p815_p2, %p814_p1 }
  0x24   : > { %p817_p5 = pnand %p816_p3, %p810_p0 }
  0xdd   : > { %v724_v11 = vpop.f32.mrf.mxu0 }
  0xde   : > { %v415_v12 = vadd.f32 %v724_v11, %v685_v10 }
  0xdf   : > { %v409_v13 = vpop.f32.mrf.mxu0 }
  0xe0   : > { %v410_v14 = vadd.f32 %v685_v10, %v409_v13 }
  0xe1   : > { %v727_v15 = vpop.f32.mrf.mxu0 }
  0xe2   : > { %799 = vtanh.f32 %v410_v14  ;;  %v425_v16 = vadd.f32 %v727_v15, %v685_v10 }
  0xe3   : > { %801 = vtanh.f32 %v415_v12  ;;  %v419_v17 = vpop.f32.mrf.mxu0 }
  0xe4   : > { %v420_v18 = vadd.f32 %v685_v10, %v419_v17 }
  0xe6   : > { %803 = vtanh.f32 %v420_v18 }
  0xe7   : > { %805 = vtanh.f32 %v425_v16 }
  0xef   : > { %v800_v19 = vpop.eup %799 }
  0xf0   : > { %v802_v20 = vpop.eup %801  ;;  %736 = vmatprep.mubr.msk.f32.mxu1 %vm438_vm2, %v800_v19 }
  0xf1   : > { %737 = vmatmul.mubr.msk.f32.vlgmr.msra.gmra.mxu1 %vm438_vm2, %v802_v20 }
  0xf3   : > { %v804_v21 = vpop.eup %803 }
  0xf4   : > { %v806_v22 = vpop.eup %805  ;;  %739 = vmatprep.mubr.msk.f32.mxu1 %vm438_vm2, %v804_v21 }
  0xf5   : > { %740 = vmatmul.mubr.msk.f32.gmra.mxu1 %vm438_vm2, %v806_v22 }
 0x1b1   : > { %v738_v24 = vpop.f32.mrf.mxu1 }
 0x1b2   : > { %v523_v25 = vadd.f32 %v738_v24, %v691_v23 }
 0x1b3   : > { %v517_v26 = vpop.f32.mrf.mxu1 }
 0x1b4   : > { %537 = vst [vmem:[%s284_s24 + $0x8] sm:$0xff] %v523_v25  ;;  %v518_v27 = vadd.f32 %v691_v23, %v517_v26 }
 0x1b5   : > { %v741_v28 = vpop.f32.mrf.mxu1 }
 0x1b6   : > { %536 = vst [vmem:[%s284_s24] sm:$0xff] %v518_v27  ;;  %v533_v29 = vadd.f32 %v741_v28, %v691_v23 }
 0x1b7   : > { %v527_v30 = vpop.f32.mrf.mxu1 }
 0x1b8   : > { %539 = vst [vmem:[%s284_s24 + $0x18] sm:$0xff] %v533_v29  ;;  %v528_v31 = vadd.f32 %v691_v23, %v527_v30 }
 0x1ba   : > { %538 = vst [vmem:[%s284_s24 + $0x10] sm:$0xff] %v528_v31 }
 0x1bb   : > { %820 = shalt.err (!%p817_p5)
}
 0x1bc   : > { %s821_s13 = scalar_lea.hbm %s1016_s7, 512  ;;  %s825_s16 = scalar_lea.hbm %s1068_s5, 1536 }
 0x1bd   : > { %p822_p6 = scmp.ne.s32.totalorder %s1016_s7, %s821_s13  ;;  %p826_p10 = scmp.lt.s32.totalorder %s1016_s7, %s1068_s5 }
 0x1be   : > { %p827_p11 = scmp.lt.s32.totalorder %s825_s16, %s821_s13 }
 0x1bf   : > { %p823_p7 = pnand %p822_p6, %p958_p4 }
 0x1c0   : > { %p828_p12 = por %p827_p11, %p826_p10 }
 0x1c1   : > { %p824_p9 = pneg %p823_p7 }
 0x1c3   : > { %p829_p13 = pnand %p828_p12, %p824_p9 }
 0x1c5   : > { %832 = shalt.err (!%p829_p13)
}
 0x1c6   : > { %s886_s27 = smov 128   ;;  %s887_s9 = smov 8  }
 0x1c7   : > { %742 = dma.vmem_to_hbm [thread:$0]  (%p958_p4), %s1011_s25, 512, %s1016_s7, %s1018_s8, %s886_s27, %s886_s27, %s887_s9  }
 0x1c8 PF: > { %p748_p0 = scmp.ge.s32.totalorder %s883_s23, 2  ;;  %s571_s29 = sand.u32 1, %s863_s18  }
 0x1c9   : > { %s572_s21 = scalar_lea.sflag [#allocation3], %s571_s29 }
 0x1ca   : > { %p745_p1 = pnand %p748_p0, %p965_p8 }
 0x1cc   : > { %p746_p2 = pneg %p745_p1 }
 0x1ce   : > { %858 = dma.done.wait (%p746_p2), %s572_s21, 512  }
 0x1cf   : > { %860 = vsyncadd (%p746_p2), %s572_s21, 4294966784  ;;  %s18_s23 = sadd.s32 1, %s883_s23   ;;  %s1071_s18 = smov %s867_s19 }
 0x1d0   : > { %p15_p3 = scmp.ge.s32.totalorder %s18_s23, 5   ;;  %s1072_s19 = smov %s871_s20 }
 0x1d1   : > { %s1073_s20 = smov %s971_s6  ;;  %s1074_s21 = smov %s879_s22 }
 0x1d2   : > { %s1075_s22 = smov %s1077_s26  ;;  %17 = sbr.rel (!%p15_p3) target bundleno = 4 (0x4), region = 87 }
 0x1d7   :  { %577 = vsyncpa [#allocation3], 1 }
 0x1d8   :  { %579 = vsyncpa [#allocation3 + $0x1], 1 }

</bundles_post_ra>
